<compile_context>
chip_gen: v7x
topology: tpu7x:2x2x1
jax: 0.10.0
libtpu: 0.0.40
codegen_flags: <defaults>
</compile_context>

<pallas_src>
import functools

import jax
import jax.numpy as jnp
from jax.experimental import pallas as pl
from jax.experimental.pallas import tpu as pltpu

_LANE = 128
_SUBLANE = 8
_NEG_BIG = -1e9


def _round_up(x, m):
    return ((x + m - 1) // m) * m


def _gat_layer_kernel(h_ref, w_ref, bias_ref, out_ref, src_scratch, *,
                      num_heads, f_out, is_last, negative_slope, tile_n):
    """One GAT layer for a [tile_n, N_pad] row block of query nodes.

    h_ref      : [N_pad, F_in_pad]            bf16 features of ALL nodes (resident)
    w_ref      : [F_in_pad, H*F_out + 2H]     bf16 [proj | W@a_src | W@a_tgt]
    bias_ref   : [tile_n, N_pad]              bf16 additive adjacency bias (0 / -1e9)
    out_ref    : [tile_n, out_width]          lane-dense (multiple of 128) output block
    src_scratch: [N_pad, H] f32               for the dynamic query-row slice
    """
    hf = num_heads * f_out
    row_start = pl.multiple_of(pl.program_id(0) * tile_n, tile_n)

    # Head-fused projection with folded attention scores: ONE MXU matmul.
    proj = jnp.dot(h_ref[...], w_ref[...],
                   preferred_element_type=jnp.float32)        # [N_pad, HF+2H]

    h_all = proj[:, :hf].astype(jnp.bfloat16)                 # keys (bf16 MXU operand)
    src_all = proj[:, hf:hf + num_heads]                      # [N_pad, H]
    tgt_all = proj[:, hf + num_heads:hf + 2 * num_heads]      # [N_pad, H]

    # One batched sublane->lane relayout per layer (not per head).
    tgt_rows = jnp.transpose(tgt_all)                         # [H, N_pad]

    # Query-block src scores: dynamic (aligned) sublane slice via VMEM scratch.
    src_scratch[...] = src_all
    src_blk = src_scratch[pl.ds(row_start, tile_n), :]        # [tile_n, H]

    bias = bias_ref[...].astype(jnp.float32)                  # [tile_n, N_pad]

    acc = None
    for hh in range(num_heads):                               # small H: unrolled
        # e_ij = LeakyReLU(src_i + tgt_j) + adjacency bias.
        e = src_blk[:, hh:hh + 1] + tgt_rows[hh:hh + 1, :]    # [tile_n, N_pad]
        e = jnp.where(e > 0, e, negative_slope * e) + bias
        # Row-wise softmax, exact division (numerically stabilised).
        e_max = jnp.max(e, axis=-1, keepdims=True)
        p = jnp.exp(e - e_max)
        attn = p / jnp.sum(p, axis=-1, keepdims=True)
        # TODO(synk): attention dropout (p=0.6) omitted — inference mode.
        head = jnp.dot(attn.astype(jnp.bfloat16),
                       h_all[:, hh * f_out:(hh + 1) * f_out],
                       preferred_element_type=jnp.float32)    # [tile_n, F_out]
        if is_last:
            acc = head if acc is None else acc + head
        else:
            # concat=True: ELU fused, stored straight into a static lane slice.
            out_ref[:, hh * f_out:(hh + 1) * f_out] = jnp.where(
                head > 0, head, jnp.exp(jnp.minimum(head, 0.0)) - 1.0
            ).astype(out_ref.dtype)

    if is_last:
        # concat=False: average heads.
        out_ref[:, :f_out] = (acc * (1.0 / num_heads)).astype(out_ref.dtype)
        used = f_out
    else:
        used = hf
    pad_w = out_ref.shape[1] - used
    if pad_w > 0:
        # Zero the lane padding so the next layer's zero weight rows stay inert.
        out_ref[:, used:] = jnp.zeros((tile_n, pad_w), out_ref.dtype)


def _vmem_budget():
    """(physical VMEM bytes, vmem_limit_bytes to request)."""
    cap = None
    try:
        info = pltpu.get_tpu_info()
        cap = getattr(info, "vmem_capacity_bytes", None)
    except Exception:
        cap = None
    if not cap:
        cap = 64 * 1024 * 1024            # conservative (v7x-sized) fallback
    # Leave ~25% headroom for double-buffered BlockSpec inputs.
    return cap, int(cap * 3 // 4)


def model_gat_forward(x, params, adj, *, alpha=0.2):
    """Forward pass of Model_GAT (inference mode: dropout == identity).

    params: per layer (W [H, F_in, F_out], a_src [H, F_out], a_tgt [H, F_out]).
    adj:    dense [N, N] adjacency WITH self-loops (pattern of norm_adj(A)).
    """
    N = x.shape[0]
    n_layers = len(params)
    f_last = params[-1][0].shape[2]

    vmem_cap, vmem_limit = _vmem_budget()
    # Row-block tile: smaller on 64 MiB-VMEM parts (v7x), larger on v5e/v6e.
    tile_cap = 128 if vmem_cap <= 64 * 1024 * 1024 else 256
    tile_n = min(tile_cap, _round_up(N, _SUBLANE))
    n_pad = _round_up(N, tile_n)
    grid = (n_pad // tile_n,)

    # Additive adjacency bias, hoisted out of the kernel head/layer loops (bf16).
    bias = jnp.where(adj > 0, 0.0, _NEG_BIG).astype(jnp.float32)
    bias = jnp.pad(bias, ((0, n_pad - N), (0, n_pad - N)),
                   constant_values=_NEG_BIG).astype(jnp.bfloat16)

    # TODO(synk): input dropout (p=0.6) omitted — inference mode.
    h = jnp.pad(x.astype(jnp.bfloat16), ((0, n_pad - N), (0, 0)))
    f_logical = x.shape[1]

    for li, (W, a_src, a_tgt) in enumerate(params):
        num_heads, f_in, f_out = W.shape
        assert f_in == f_logical, (f_in, f_logical)
        is_last = li == n_layers - 1

        # Head-fused projection with folded attention score columns:
        # [ H*F_out projection | H src scores | H tgt scores ].
        w_flat = jnp.transpose(W, (1, 0, 2)).reshape(f_in, num_heads * f_out)
        wa_src = jnp.einsum('hif,hf->ih', W, a_src)           # [F_in, H]
        wa_tgt = jnp.einsum('hif,hf->ih', W, a_tgt)           # [F_in, H]
        w_aug = jnp.concatenate([w_flat, wa_src, wa_tgt], axis=1)
        f_in_pad = h.shape[1]
        if f_in_pad > f_in:                                   # zero rows for lane padding
            w_aug = jnp.pad(w_aug, ((0, f_in_pad - f_in), (0, 0)))
        w_aug = w_aug.astype(jnp.bfloat16)
        n_cols = w_aug.shape[1]

        out_logical = f_out if is_last else num_heads * f_out
        out_width = _round_up(out_logical, _LANE)             # lane-dense output slab
        out_dtype = jnp.float32 if is_last else jnp.bfloat16

        # Rough cost hint for the XLA scheduler.
        n_blocks = grid[0]
        flops = (2 * n_pad * f_in_pad * n_cols * n_blocks     # fused projection (per block)
                 + 2 * n_pad * n_pad * f_out * num_heads      # aggregation
                 + 8 * n_pad * n_pad * num_heads)             # mask / softmax elementwise
        transc = n_pad * n_pad * num_heads + (0 if is_last else n_pad * out_logical)
        bytes_acc = (h.size * 2 + w_aug.size * 2 + bias.size * 2
                     + n_pad * out_width * (4 if is_last else 2))

        kernel = functools.partial(
            _gat_layer_kernel, num_heads=num_heads, f_out=f_out,
            is_last=is_last, negative_slope=alpha, tile_n=tile_n)

        h = pl.pallas_call(
            kernel,
            out_shape=jax.ShapeDtypeStruct((n_pad, out_width), out_dtype),
            grid=grid,
            in_specs=[
                pl.BlockSpec((n_pad, f_in_pad), lambda i: (0, 0)),    # all-node feats (resident)
                pl.BlockSpec((f_in_pad, n_cols), lambda i: (0, 0)),   # fused weights (resident)
                pl.BlockSpec((tile_n, n_pad), lambda i: (i, 0)),      # bias row block (pipelined)
            ],
            out_specs=pl.BlockSpec((tile_n, out_width), lambda i: (i, 0)),
            scratch_shapes=[pltpu.VMEM((n_pad, num_heads), jnp.float32)],
            compiler_params=pltpu.CompilerParams(
                dimension_semantics=("parallel",),
                vmem_limit_bytes=vmem_limit),
            cost_estimate=pl.CostEstimate(flops=int(flops),
                                          transcendentals=int(transc),
                                          bytes_accessed=int(bytes_acc)),
        )(h, w_aug, bias)

        f_logical = out_logical

    return h[:N, :f_last].astype(jnp.float32)


def init_gat_params(key, n_dims, n_heads):
    """Deterministic synthetic parameters matching Model_GAT.__init__ shapes."""
    params = []
    n_in = n_dims[0]
    n_layers = len(n_dims) - 1
    for i in range(n_layers):
        f_out = n_dims[i + 1]
        heads = n_heads[i]
        key, kw, ks, kt = jax.random.split(key, 4)
        W = jax.random.normal(kw, (heads, n_in, f_out), jnp.float32) * 0.1
        a_s = jax.random.normal(ks, (heads, f_out), jnp.float32) * 0.1
        a_t = jax.random.normal(kt, (heads, f_out), jnp.float32) * 0.1
        params.append((W, a_s, a_t))
        if i < n_layers - 1:
            n_in = f_out * heads
    return params


if __name__ == "__main__":
    key = jax.random.PRNGKey(0)

    # Small graph: 32 nodes, 16 input features.
    N = 32
    n_dims = [16, 8, 4]     # in_features -> hidden(per head) -> out_features
    n_heads = [2, 1]        # heads for hidden layer and final layer

    key, kx, ka, kp = jax.random.split(key, 4)
    x = jax.random.normal(kx, (N, n_dims[0]), jnp.float32)

    # Random symmetric adjacency with self-loops (sparsity pattern of norm_adj(A)).
    upper = (jax.random.uniform(ka, (N, N)) < 0.2).astype(jnp.float32)
    adj = jnp.clip(upper + upper.T + jnp.eye(N, dtype=jnp.float32), 0.0, 1.0)
    assert bool(jnp.all(jnp.diag(adj) > 0))   # precondition: self-loops present

    params = init_gat_params(kp, n_dims, n_heads)

    out = model_gat_forward(x, params, adj, alpha=0.2)
    out = jax.block_until_ready(out)
    assert out.shape == (N, n_dims[-1]), out.shape
    assert bool(jnp.all(jnp.isfinite(out)))
    print("KERNEL_OK")
</pallas_src>

<mosaic_0001>
module attributes {stable_mosaic.version = 11 : i64} {
  func.func @_gat_layer_kernel(%arg0: i32, %arg1: memref<32x16xbf16, #tpu.memory_space<vmem>>, %arg2: memref<16x20xbf16, #tpu.memory_space<vmem>>, %arg3: memref<32x32xbf16, #tpu.memory_space<vmem>>, %arg4: memref<32x128xbf16, #tpu.memory_space<vmem>>, %arg5: memref<32x2xf32, #tpu.memory_space<vmem>>) attributes {dimension_semantics = [#tpu.dimension_semantics<parallel>], iteration_bounds = array<i64: 1>, scalar_prefetch = 0 : i64, scratch_operands = 1 : i64, tpu.core_type = #tpu.core_type<tc>, window_params = [{pipeline_mode = #tpu.pipeline_mode<synchronous>, transform_indices = @transform_0, window_bounds = array<i64: 32, 16>}, {pipeline_mode = #tpu.pipeline_mode<synchronous>, transform_indices = @transform_1, window_bounds = array<i64: 16, 20>}, {transform_indices = @transform_2, window_bounds = array<i64: 32, 32>}, {transform_indices = @transform_3, window_bounds = array<i64: 32, 128>}]} {
    %c32_i32 = arith.constant 32 : i32
    %0 = arith.muli %arg0, %c32_i32 : i32
    %1 = tpu.assume_multiple %0, 32 : i32
    %c0 = arith.constant 0 : index
    %c0_0 = arith.constant 0 : index
    %2 = vector.load %arg1[%c0, %c0_0] : memref<32x16xbf16, #tpu.memory_space<vmem>>, vector<32x16xbf16>
    %c0_1 = arith.constant 0 : index
    %c0_2 = arith.constant 0 : index
    %3 = vector.load %arg2[%c0_1, %c0_2] : memref<16x20xbf16, #tpu.memory_space<vmem>>, vector<16x20xbf16>
    %cst = arith.constant dense<0.000000e+00> : vector<32x20xf32>
    %4 = tpu.matmul %2, %3, %cst {dimension_numbers = #tpu.dot_dimension_numbers<[1], [0], [0], [1], [0, 0, 1, 1], [], []>} : vector<32x16xbf16>, vector<16x20xbf16>, vector<32x20xf32> -> vector<32x20xf32>
    %5 = vector.extract_strided_slice %4 {offsets = [0, 0], sizes = [32, 16], strides = [1, 1]} : vector<32x20xf32> to vector<32x16xf32>
    %6 = arith.truncf %5 : vector<32x16xf32> to vector<32x16xbf16>
    %7 = vector.extract_strided_slice %4 {offsets = [0, 16], sizes = [32, 2], strides = [1, 1]} : vector<32x20xf32> to vector<32x2xf32>
    %8 = vector.extract_strided_slice %4 {offsets = [0, 18], sizes = [32, 2], strides = [1, 1]} : vector<32x20xf32> to vector<32x2xf32>
    %9 = tpu.transpose %8, [1, 0] : vector<32x2xf32> -> vector<2x32xf32>
    %c0_3 = arith.constant 0 : index
    %c0_4 = arith.constant 0 : index
    %10 = vector.load %arg5[%c0_3, %c0_4] : memref<32x2xf32, #tpu.memory_space<vmem>>, vector<32x2xf32>
    tpu.vector_store %arg5[%c0_3, %c0_4], %7 {strides = array<i32>} : memref<32x2xf32, #tpu.memory_space<vmem>>, vector<32x2xf32>,
    %11 = arith.index_cast %1 : i32 to index
    %c0_5 = arith.constant 0 : index
    %12 = vector.load %arg5[%11, %c0_5] : memref<32x2xf32, #tpu.memory_space<vmem>>, vector<32x2xf32>
    %c0_6 = arith.constant 0 : index
    %c0_7 = arith.constant 0 : index
    %13 = vector.load %arg3[%c0_6, %c0_7] : memref<32x32xbf16, #tpu.memory_space<vmem>>, vector<32x32xbf16>
    %14 = arith.extf %13 : vector<32x32xbf16> to vector<32x32xf32>
    %15 = vector.extract_strided_slice %12 {offsets = [0, 0], sizes = [32, 1], strides = [1, 1]} : vector<32x2xf32> to vector<32x1xf32>
    %16 = vector.extract_strided_slice %9 {offsets = [0, 0], sizes = [1, 32], strides = [1, 1]} : vector<2x32xf32> to vector<1x32xf32>
    %17 = vector.broadcast %15 : vector<32x1xf32> to vector<32x32xf32>
    %18 = vector.broadcast %16 : vector<1x32xf32> to vector<32x32xf32>
    %19 = arith.addf %17, %18 : vector<32x32xf32>
    %cst_8 = arith.constant 0.000000e+00 : f32
    %20 = vector.broadcast %cst_8 : f32 to vector<32x32xf32>
    %21 = arith.cmpf ogt, %19, %20 : vector<32x32xf32>
    %cst_9 = arith.constant 2.000000e-01 : f32
    %22 = vector.broadcast %cst_9 : f32 to vector<32x32xf32>
    %23 = arith.mulf %22, %19 : vector<32x32xf32>
    %24 = arith.select %21, %19, %23 : vector<32x32xi1>, vector<32x32xf32>
    %25 = arith.addf %24, %14 : vector<32x32xf32>
    %cst_10 = arith.constant dense<0xFF800000> : vector<32xf32>
    %26 = vector.multi_reduction <maximumf>, %25, %cst_10 [1] : vector<32x32xf32> to vector<32xf32>
    %27 = vector.shape_cast %26 : vector<32xf32> to vector<32x1xf32>
    %28 = vector.broadcast %27 : vector<32x1xf32> to vector<32x32xf32>
    %29 = arith.subf %25, %28 : vector<32x32xf32>
    %30 = math.exp %29 : vector<32x32xf32>
    %cst_11 = arith.constant dense<0.000000e+00> : vector<32xf32>
    %31 = vector.multi_reduction <add>, %30, %cst_11 [1] : vector<32x32xf32> to vector<32xf32>
    %32 = vector.shape_cast %31 : vector<32xf32> to vector<32x1xf32>
    %33 = vector.broadcast %32 : vector<32x1xf32> to vector<32x32xf32>
    %34 = arith.divf %30, %33 : vector<32x32xf32>
    %35 = arith.truncf %34 : vector<32x32xf32> to vector<32x32xbf16>
    %36 = vector.extract_strided_slice %6 {offsets = [0, 0], sizes = [32, 8], strides = [1, 1]} : vector<32x16xbf16> to vector<32x8xbf16>
    %cst_12 = arith.constant dense<0.000000e+00> : vector<32x8xf32>
    %37 = tpu.matmul %35, %36, %cst_12 {dimension_numbers = #tpu.dot_dimension_numbers<[1], [0], [0], [1], [0, 0, 1, 1], [], []>} : vector<32x32xbf16>, vector<32x8xbf16>, vector<32x8xf32> -> vector<32x8xf32>
    %cst_13 = arith.constant 0.000000e+00 : f32
    %38 = vector.broadcast %cst_13 : f32 to vector<32x8xf32>
    %39 = arith.cmpf ogt, %37, %38 : vector<32x8xf32>
    %cst_14 = arith.constant 0.000000e+00 : f32
    %40 = vector.broadcast %cst_14 : f32 to vector<32x8xf32>
    %41 = arith.minimumf %37, %40 : vector<32x8xf32>
    %42 = math.exp %41 : vector<32x8xf32>
    %cst_15 = arith.constant 1.000000e+00 : f32
    %43 = vector.broadcast %cst_15 : f32 to vector<32x8xf32>
    %44 = arith.subf %42, %43 : vector<32x8xf32>
    %45 = arith.select %39, %37, %44 : vector<32x8xi1>, vector<32x8xf32>
    %46 = arith.truncf %45 : vector<32x8xf32> to vector<32x8xbf16>
    %c0_16 = arith.constant 0 : index
    %c0_17 = arith.constant 0 : index
    %47 = vector.load %arg4[%c0_16, %c0_17] : memref<32x128xbf16, #tpu.memory_space<vmem>>, vector<32x8xbf16>
    tpu.vector_store %arg4[%c0_16, %c0_17], %46 {strides = array<i32>} : memref<32x128xbf16, #tpu.memory_space<vmem>>, vector<32x8xbf16>,
    %48 = vector.extract_strided_slice %12 {offsets = [0, 1], sizes = [32, 1], strides = [1, 1]} : vector<32x2xf32> to vector<32x1xf32>
    %49 = vector.extract_strided_slice %9 {offsets = [1, 0], sizes = [1, 32], strides = [1, 1]} : vector<2x32xf32> to vector<1x32xf32>
    %50 = vector.broadcast %48 : vector<32x1xf32> to vector<32x32xf32>
    %51 = vector.broadcast %49 : vector<1x32xf32> to vector<32x32xf32>
    %52 = arith.addf %50, %51 : vector<32x32xf32>
    %cst_18 = arith.constant 0.000000e+00 : f32
    %53 = vector.broadcast %cst_18 : f32 to vector<32x32xf32>
    %54 = arith.cmpf ogt, %52, %53 : vector<32x32xf32>
    %cst_19 = arith.constant 2.000000e-01 : f32
    %55 = vector.broadcast %cst_19 : f32 to vector<32x32xf32>
    %56 = arith.mulf %55, %52 : vector<32x32xf32>
    %57 = arith.select %54, %52, %56 : vector<32x32xi1>, vector<32x32xf32>
    %58 = arith.addf %57, %14 : vector<32x32xf32>
    %cst_20 = arith.constant dense<0xFF800000> : vector<32xf32>
    %59 = vector.multi_reduction <maximumf>, %58, %cst_20 [1] : vector<32x32xf32> to vector<32xf32>
    %60 = vector.shape_cast %59 : vector<32xf32> to vector<32x1xf32>
    %61 = vector.broadcast %60 : vector<32x1xf32> to vector<32x32xf32>
    %62 = arith.subf %58, %61 : vector<32x32xf32>
    %63 = math.exp %62 : vector<32x32xf32>
    %cst_21 = arith.constant dense<0.000000e+00> : vector<32xf32>
    %64 = vector.multi_reduction <add>, %63, %cst_21 [1] : vector<32x32xf32> to vector<32xf32>
    %65 = vector.shape_cast %64 : vector<32xf32> to vector<32x1xf32>
    %66 = vector.broadcast %65 : vector<32x1xf32> to vector<32x32xf32>
    %67 = arith.divf %63, %66 : vector<32x32xf32>
    %68 = arith.truncf %67 : vector<32x32xf32> to vector<32x32xbf16>
    %69 = vector.extract_strided_slice %6 {offsets = [0, 8], sizes = [32, 8], strides = [1, 1]} : vector<32x16xbf16> to vector<32x8xbf16>
    %cst_22 = arith.constant dense<0.000000e+00> : vector<32x8xf32>
    %70 = tpu.matmul %68, %69, %cst_22 {dimension_numbers = #tpu.dot_dimension_numbers<[1], [0], [0], [1], [0, 0, 1, 1], [], []>} : vector<32x32xbf16>, vector<32x8xbf16>, vector<32x8xf32> -> vector<32x8xf32>
    %cst_23 = arith.constant 0.000000e+00 : f32
    %71 = vector.broadcast %cst_23 : f32 to vector<32x8xf32>
    %72 = arith.cmpf ogt, %70, %71 : vector<32x8xf32>
    %cst_24 = arith.constant 0.000000e+00 : f32
    %73 = vector.broadcast %cst_24 : f32 to vector<32x8xf32>
    %74 = arith.minimumf %70, %73 : vector<32x8xf32>
    %75 = math.exp %74 : vector<32x8xf32>
    %cst_25 = arith.constant 1.000000e+00 : f32
    %76 = vector.broadcast %cst_25 : f32 to vector<32x8xf32>
    %77 = arith.subf %75, %76 : vector<32x8xf32>
    %78 = arith.select %72, %70, %77 : vector<32x8xi1>, vector<32x8xf32>
    %79 = arith.truncf %78 : vector<32x8xf32> to vector<32x8xbf16>
    %c0_26 = arith.constant 0 : index
    %c8 = arith.constant 8 : index
    %80 = vector.load %arg4[%c0_26, %c8] : memref<32x128xbf16, #tpu.memory_space<vmem>>, vector<32x8xbf16>
    tpu.vector_store %arg4[%c0_26, %c8], %79 {strides = array<i32>} : memref<32x128xbf16, #tpu.memory_space<vmem>>, vector<32x8xbf16>,
    %cst_27 = arith.constant 0.000000e+00 : bf16
    %81 = vector.broadcast %cst_27 : bf16 to vector<32x112xbf16>
    %c0_28 = arith.constant 0 : index
    %c16 = arith.constant 16 : index
    %82 = vector.load %arg4[%c0_28, %c16] : memref<32x128xbf16, #tpu.memory_space<vmem>>, vector<32x112xbf16>
    tpu.vector_store %arg4[%c0_28, %c16], %81 {strides = array<i32>} : memref<32x128xbf16, #tpu.memory_space<vmem>>, vector<32x112xbf16>,
    return
  }
  func.func @transform_0(%arg0: i32) -> (i32, i32) {
    %c0_i32 = arith.constant 0 : i32
    %c0_i32_0 = arith.constant 0 : i32
    %c0_i32_1 = arith.constant 0 : i32
    return %c0_i32, %c0_i32_0 : i32, i32
  }
  func.func @transform_1(%arg0: i32) -> (i32, i32) {
    %c0_i32 = arith.constant 0 : i32
    %c0_i32_0 = arith.constant 0 : i32
    %c0_i32_1 = arith.constant 0 : i32
    return %c0_i32, %c0_i32_0 : i32, i32
  }
  func.func @transform_2(%arg0: i32) -> (i32, i32) {
    %c0_i32 = arith.constant 0 : i32
    %c0_i32_0 = arith.constant 0 : i32
    return %arg0, %c0_i32 : i32, i32
  }
  func.func @transform_3(%arg0: i32) -> (i32, i32) {
    %c0_i32 = arith.constant 0 : i32
    %c0_i32_0 = arith.constant 0 : i32
    return %arg0, %c0_i32 : i32, i32
  }
}

</mosaic_0001>

<bundles_post_ra>
// kernel: tpu_custom_call.1
= control target key start
LH: loop header
LB: loop body
LE: loop exit
PB: predicated region body
PF: predicated region fallthrough
CT: control target
= control target key end

     0   :  { %vm39_vm0 = vcmask 130048   ;;  %s850_s0 = inlined_call_operand.vmem [shape: bf16[32,16], index: 0, kind: input, shape index: {}]   ;;  %s851_s1 = inlined_call_operand.vmem [shape: bf16[16,20], index: 1, kind: input, shape index: {}]   ;;  %s852_s2 = inlined_call_operand.vmem [shape: bf16[32,32], index: 2, kind: input, shape index: {}]   ;;  %s853_s3 = inlined_call_operand.hbm [shape: bf16[32,128], index: 3, kind: output, shape index: {}]  }
   0x1   :  { %v678_v0 = vld [vmem:[%s851_s1] sm:$0xff]   ;;  %v680_v2 = vld [vmem:[%s850_s0 + $0x8] sm:$0xff]  }
   0x2   :  { %v679_v1 = vld [vmem:[%s850_s0] sm:$0xff]   ;;  %642 = vmatprep.subr.bf16.mxu0 %v678_v0 }
   0x3   :  { %643 = vmatpush3.bf16.msra.mxu0 %v678_v0  ;;  %644 = vmatprep.mubr.msk.bf16.mxu0 %vm39_vm0, %v679_v1 }
   0x4   :  { %8 = vsyncpa [#allocation4], 0  ;;  %v753_v3 = vmov 1   ;;  %s754_s18 = smov 112   ;;  %s755_s0 = smov 110   ;;  %vm157_vm1 = vcmask 15360   ;;  %v195_v24 = vlaneseq }
   0x5   :  { %674 = vset.pattern.permute.xlu1 %v753_v3  ;;  %675 = vset.pattern.permute.xlu0 %v753_v3  ;;  %v756_v18 = vmov 0   ;;  %v623_v34 = vld [vmem:[%s852_s2] sm:$0xff]   ;;  %v630_v38 = vld [vmem:[%s852_s2 + $0x8] sm:$0xff]   ;;  %vm219_vm4 = vcmask 261120   ;;  %s757_s2 = smov 120   ;;  %s758_s22 = smov 8  }
   0x6   :  { %645 = vmatmul.mubr.msk.bf16.vlgmr.msra.gmra.mrb[0].mxu0 %vm39_vm0, %v680_v2  ;;  %v196_v27 = vshrl.u32 %v195_v24, 7  ;;  %v625_v42 = vunpack.c.h.bf16 %v623_v34  ;;  %v624_v43 = vunpack.c.l.bf16 %v623_v34  ;;  %v628_v46 = vunpack.c.l.bf16 %v630_v38  ;;  %s759_s23 = smov [#allocation3]  }
   0x7   :  { %v629_v59 = vunpack.c.h.bf16 %v630_v38  ;;  %s578_s24 = sshll.u32 %s759_s23, 4  ;;  %s579_s24 = int_to_ptr.vmem [resolvable:$true] %s578_s24 }
   0x8   :  { %v384_v29 = vsub.s32 1, %v196_v27  ;;  %v197_v31 = vsub.s32 0, %v196_v27  ;;  %s729_s25 = scalar_lea.vmem %s579_s24, 256  ;;  %p734_p1 = scmp.lt.s32.totalorder %s579_s24, %s579_s24 }
   0x9   :  { %p730_p0 = scmp.ne.s32.totalorder %s579_s24, %s729_s25  ;;  %p735_p2 = scmp.lt.s32.totalorder %s729_s25, %s729_s25 }
   0xb   :  { %p736_p3 = por %p735_p2, %p734_p1 }
   0xd   :  { %p737_p4 = pnand %p736_p3, %p730_p0 }
  0xd9   :  { %v646_v4 = vpop.f32.mrb[0].mxu0 }
  0xda   :  { %149 = vrot.lane.b32.xlu1 %v646_v4, %s754_s18  ;;  %v80_v5 = vpop.f32.mrb[1].mxu0 }
  0xdb   :  { %145 = vrot.lane.b32.xlu0 %v80_v5, %s754_s18  ;;  %v647_v6 = vpop.f32.mrb[2].mxu0 }
  0xdc   :  { %v791_v7 = vpack.c.bf16 %v647_v6, %v646_v4  ;;  %v83_v8 = vpop.f32.mrb[3].mxu0 }
  0xdd   :  { %v793_v9 = vpack.c.bf16 %v83_v8, %v80_v5 }
  0xde   :  { %151 = vrot.lane.b32.xlu1 %v647_v6, %s754_s18 }
  0xdf   :  { %147 = vrot.lane.b32.xlu0 %v83_v8, %s754_s18  ;;  %648 = vmatprep.subr.bf16.mxu1 %v793_v9 }
  0xe0   :  { %649 = vmatpush3.bf16.msra.mxu1 %v793_v9 }
  0xe1   :  { %650 = vmatprep.subr.bf16.mxu1 %v791_v7 }
  0xe2   :  { %103 = vrot.lane.b32.xlu1 %v83_v8, %s755_s0 }
  0xe3   :  { %101 = vrot.lane.b32.xlu0 %v80_v5, %s755_s0 }
  0xe4   :  { %651 = vmatpush3.bf16.msra.mxu1 %v791_v7 }
  0xe6   :  { %107 = vrot.lane.b32.xlu1 %v647_v6, %s755_s0 }
  0xe7   :  { %105 = vrot.lane.b32.xlu0 %v646_v4, %s755_s0 }
 0x14c   :  { %v150_v10 = vpop.permute.xlu1 %149 }
 0x14d   :  { %160 = vst.msk [vmem:[#allocation2 + $0x10] sm:$0xff] %vm157_vm1, %v150_v10  ;;  %v146_v11 = vpop.permute.xlu0 %145 }
 0x14e   :  { %158 = vst.msk [vmem:[#allocation2] sm:$0xff] %vm157_vm1, %v146_v11 }
 0x150   :  { %v152_v12 = vpop.permute.xlu1 %151 }
 0x151   :  { %161 = vst.msk [vmem:[#allocation2 + $0x18] sm:$0xff] %vm157_vm1, %v152_v12  ;;  %v148_v13 = vpop.permute.xlu0 %147 }
 0x152   :  { %159 = vst.msk [vmem:[#allocation2 + $0x8] sm:$0xff] %vm157_vm1, %v148_v13  ;;  %vm361_vm1 = vcmask 60416  }
 0x154   :  { %v165_v14 = vld [vmem:[#allocation2 + $0x10] sm:$0xff]  ;;  %v104_v20 = vpop.permute.xlu1 %103 }
 0x155   :  { %375 = vperm.xlu1 %674, %v165_v14   ;;  %v163_v15 = vld [vmem:[#allocation2] sm:$0xff]  ;;  %v102_v19 = vpop.permute.xlu0 %101 }
 0x156   :  { %367 = vperm.xlu0 %675, %v163_v15  }
 0x158   :  { %v166_v16 = vld [vmem:[#allocation2 + $0x18] sm:$0xff]  ;;  %v108_v22 = vpop.permute.xlu1 %107 }
 0x159   :  { %v164_v17 = vld [vmem:[#allocation2 + $0x8] sm:$0xff]  ;;  %v106_v21 = vpop.permute.xlu0 %105 }
 0x15a   :  { %379 = vperm.xlu0 %675, %v166_v16   ;;  %371 = vperm.xlu1 %674, %v164_v17  }
 0x15e   :  { %676 = vset.pattern.permute.xlu0 %v756_v18 }
 0x15f   :  { %177 = vperm.xlu0 %676, %v163_v15  }
 0x163   :  { %182 = vperm.xlu0 %676, %v164_v17  }
 0x167   :  { %187 = vperm.xlu0 %676, %v165_v14  }
 0x16b   :  { %192 = vperm.xlu0 %676, %v166_v16  }
 0x16f   :  { %677 = vset.pattern.permute.xlu0 %v753_v3 }
 0x183   :  { %113 = vxpose.xlu1.b32.start [1/4] (short) (narrow) %v102_v19, 8 }
 0x187   :  { %114 = vxpose.xlu1.b32.cont [2/4] (short) (narrow) %v104_v20, 8 }
 0x18b   :  { %115 = vxpose.xlu1.b32.cont [3/4] (short) (narrow) %v106_v21, 8 }
 0x18f   :  { %116 = vxpose.xlu1.b32.end [4/4] (short) (narrow) %v108_v22, 8 }
 0x1d4   :  { %v376_v25 = vpop.permute.xlu1 %375 }
 0x1d5   :  { %v368_v23 = vpop.permute.xlu0 %367 }
 0x1d9   :  { %v380_v26 = vpop.permute.xlu0 %379  ;;  %v372_v28 = vpop.permute.xlu1 %371 }
 0x1de   :  { %v178_v30 = vpop.permute.xlu0 %177 }
 0x1e2   :  { %v183_v41 = vpop.permute.xlu0 %182 }
 0x1e6   :  { %v188_v55 = vpop.permute.xlu0 %187 }
 0x1ea   :  { %v193_v4 = vpop.permute.xlu0 %192 }
 0x203   :  { %v129_v32 = vpop.trf.xlu1 }
 0x204   :  { %v385_v33 = vrot.slane %v129_v32, %v384_v29  ;;  %v198_v35 = vrot.slane %v129_v32, %v197_v31 }
 0x206   :  { %v387_v36 = vadd.f32 %v385_v33, %v372_v28  ;;  %v386_v37 = vadd.f32 %v385_v33, %v368_v23  ;;  %v388_v39 = vadd.f32 %v385_v33, %v376_v25  ;;  %v389_v40 = vadd.f32 %v385_v33, %v380_v26 }
 0x207   :  { %v199_v51 = vadd.f32 %v198_v35, %v178_v30  ;;  %v201_v62 = vadd.f32 %v198_v35, %v188_v55  ;;  %v200_v3 = vadd.f32 %v198_v35, %v183_v41  ;;  %v202_v11 = vadd.f32 %v198_v35, %v193_v4 }
 0x208   :  { %vm391_vm2 = vcmp.gt.f32.partialorder %v387_v36, 0.0  ;;  %v395_v44 = vmul.f32 0.2, %v387_v36  ;;  %vm390_vm3 = vcmp.gt.f32.partialorder %v386_v37, 0.0  ;;  %v394_v45 = vmul.f32 0.2, %v386_v37 }
 0x209   :  { %vm392_vm5 = vcmp.gt.f32.partialorder %v388_v39, 0.0  ;;  %v396_v47 = vmul.f32 0.2, %v388_v39  ;;  %v397_v50 = vmul.f32 0.2, %v389_v40  ;;  %vm393_vm6 = vcmp.gt.f32.partialorder %v389_v40, 0.0 }
 0x20a   :  { %v399_v48 = vsel %vm391_vm2, %v387_v36, %v395_v44  ;;  %v398_v49 = vsel %vm390_vm3, %v386_v37, %v394_v45  ;;  %v207_v61 = vmul.f32 0.2, %v199_v51  ;;  %vm203_vm7 = vcmp.gt.f32.partialorder %v199_v51, 0.0 }
 0x20b   :  { %v806_v52 = vadd.f32 %v625_v42, %v399_v48  ;;  %v402_v53 = vadd.f32 %v624_v43, %v398_v49  ;;  %v400_v54 = vsel %vm392_vm5, %v388_v39, %v396_v47  ;;  %v401_v60 = vsel %vm393_vm6, %v389_v40, %v397_v50 }
 0x20c   :  { %v404_v58 = vadd.f32 %v628_v46, %v400_v54  ;;  %v405_v0 = vadd.f32 %v629_v59, %v401_v60  ;;  %v211_v1 = vsel %vm203_vm7, %v199_v51, %v207_v61  ;;  %v209_v2 = vmul.f32 0.2, %v201_v62 }
 0x20d   :  { %v409_v56 = vsel %vm219_vm4, %v806_v52, -inf  ;;  %v406_v57 = vsel %vm219_vm4, %v402_v53, -inf  ;;  %vm205_vm8 = vcmp.gt.f32.partialorder %v201_v62, 0.0  ;;  %v215_v6 = vadd.f32 %v624_v43, %v211_v1 }
 0x20e   :  { %410 = vmax.xlane.f32.xlu1 %v409_v56  ;;  %407 = vmax.xlane.f32.xlu0 %v406_v57  ;;  %v412_v63 = vsel %vm219_vm4, %v404_v58, -inf  ;;  %v415_v5 = vsel %vm219_vm4, %v405_v0, -inf  ;;  %v213_v8 = vsel %vm205_vm8, %v201_v62, %v209_v2  ;;  %v208_v10 = vmul.f32 0.2, %v200_v3 }
 0x20f   :  { %vm204_vm9 = vcmp.gt.f32.partialorder %v200_v3, 0.0  ;;  %v220_v12 = vsel %vm219_vm4, %v215_v6, -inf  ;;  %v217_v13 = vadd.f32 %v628_v46, %v213_v8  ;;  %v210_v15 = vmul.f32 0.2, %v202_v11 }
 0x210   :  { %v212_v14 = vsel %vm204_vm9, %v200_v3, %v208_v10  ;;  %vm206_vm10 = vcmp.gt.f32.partialorder %v202_v11, 0.0  ;;  %vm568_vm5 = vcmask 1043584  }
 0x211   :  { %v226_v16 = vsel %vm219_vm4, %v217_v13, -inf  ;;  %v216_v17 = vadd.f32 %v625_v42, %v212_v14  ;;  %v214_v19 = vsel %vm206_vm10, %v202_v11, %v210_v15 }
 0x212   :  { %413 = vmax.xlane.f32.xlu0 %v412_v63  ;;  %v218_v21 = vadd.f32 %v629_v59, %v214_v19 }
 0x213   :  { %v223_v20 = vsel %vm219_vm4, %v216_v17, -inf }
 0x214   :  { %v229_v22 = vsel %vm219_vm4, %v218_v21, -inf }
 0x216   :  { %416 = vmax.xlane.f32.xlu0 %v415_v5 }
 0x21a   :  { %221 = vmax.xlane.f32.xlu0 %v220_v12 }
 0x21e   :  { %227 = vmax.xlane.f32.xlu0 %v226_v16 }
 0x21f   :  { %454 = vrot.lane.b32.xlu1 %v793_v9, %s757_s2 }
 0x222   :  { %224 = vmax.xlane.f32.xlu0 %v223_v20 }
 0x226   :  { %230 = vmax.xlane.f32.xlu0 %v229_v22 }
 0x29b   :  { %v411_v23 = vpop.xlane.xlu1 %410  ;;  %v408_v24 = vpop.xlane.xlu0 %407 }
 0x29c   :  { %v418_v25 = vsub.f32 %v402_v53, %v408_v24  ;;  %v419_v32 = vsub.f32 %v806_v52, %v411_v23 }
 0x29e   :  { %v422_v29 = vmul.f32 1.442695, %v418_v25  ;;  %v424_v36 = vmul.f32 1.442695, %v419_v32 }
 0x29f   :  { %v414_v26 = vpop.xlane.xlu0 %413  ;;  %v455_v27 = vpop.permute.xlu1 %454 }
 0x2a0   :  { %v420_v28 = vsub.f32 %v404_v58, %v414_v26  ;;  %656 = vmatprep.subr.bf16.mxu0 %v455_v27 }
 0x2a1   :  { %657 = vmatpush3.bf16.msra.mxu0 %v455_v27 }
 0x2a2   :  { %v426_v30 = vmul.f32 1.442695, %v420_v28 }
 0x2a3   :  { %v417_v31 = vpop.xlane.xlu0 %416 }
 0x2a4   :  { %681 = vpow2.f32 %v426_v30  ;;  %v421_v9 = vsub.f32 %v405_v0, %v417_v31 }
 0x2a5   :  { %683 = vpow2.f32 %v422_v29 }
 0x2a6   :  { %v428_v33 = vmul.f32 1.442695, %v421_v9 }
 0x2a7   :  { %v222_v34 = vpop.xlane.xlu0 %221 }
 0x2a8   :  { %v232_v35 = vsub.f32 %v215_v6, %v222_v34  ;;  %685 = vpow2.f32 %v428_v33 }
 0x2aa   :  { %v236_v37 = vmul.f32 1.442695, %v232_v35 }
 0x2ab   :  { %v228_v38 = vpop.xlane.xlu0 %227 }
 0x2ac   :  { %687 = vpow2.f32 %v236_v37  ;;  %v234_v39 = vsub.f32 %v217_v13, %v228_v38 }
 0x2ad   :  { %689 = vpow2.f32 %v424_v36 }
 0x2ae   :  { %v682_v40 = vpop.eup %681  ;;  %v240_v41 = vmul.f32 1.442695, %v234_v39 }
 0x2af   :  { %v436_v42 = vsel %vm219_vm4, %v682_v40, 0.0  ;;  %v684_v43 = vpop.eup %683  ;;  %v225_v53 = vpop.xlane.xlu0 %224 }
 0x2b0   :  { %691 = vpow2.f32 %v240_v41  ;;  %437 = vadd.xlane.f32.xlu0 %v436_v42  ;;  %v430_v44 = vsel %vm219_vm4, %v684_v43, 0.0  ;;  %v233_v54 = vsub.f32 %v216_v17, %v225_v53 }
 0x2b2   :  { %v686_v45 = vpop.eup %685  ;;  %v238_v56 = vmul.f32 1.442695, %v233_v54 }
 0x2b3   :  { %v439_v47 = vsel %vm219_vm4, %v686_v45, 0.0  ;;  %v231_v55 = vpop.xlane.xlu0 %230 }
 0x2b4   :  { %431 = vadd.xlane.f32.xlu0 %v430_v44  ;;  %v235_v57 = vsub.f32 %v218_v21, %v231_v55  ;;  %693 = vpow2.f32 %v238_v56 }
 0x2b6   :  { %v688_v46 = vpop.eup %687  ;;  %v242_v58 = vmul.f32 1.442695, %v235_v57 }
 0x2b7   :  { %v244_v48 = vsel %vm219_vm4, %v688_v46, 0.0  ;;  %v690_v49 = vpop.eup %689 }
 0x2b8   :  { %440 = vadd.xlane.f32.xlu0 %v439_v47  ;;  %245 = vadd.xlane.f32.xlu1 %v244_v48  ;;  %v433_v51 = vsel %vm219_vm4, %v690_v49, 0.0  ;;  %695 = vpow2.f32 %v242_v58 }
 0x2ba   :  { %v692_v50 = vpop.eup %691 }
 0x2bb   :  { %v250_v52 = vsel %vm219_vm4, %v692_v50, 0.0 }
 0x2bc   :  { %434 = vadd.xlane.f32.xlu0 %v433_v51  ;;  %251 = vadd.xlane.f32.xlu1 %v250_v52 }
 0x2be   :  { %v694_v59 = vpop.eup %693 }
 0x2bf   :  { %v247_v60 = vsel %vm219_vm4, %v694_v59, 0.0 }
 0x2c2   :  { %v696_v61 = vpop.eup %695 }
 0x2c3   :  { %v253_v62 = vsel %vm219_vm4, %v696_v61, 0.0 }
 0x2d2   :  { %456 = vrot.lane.b32.xlu0 %v791_v7, %s757_s2 }
 0x2f1   :  { %248 = vadd.xlane.f32.xlu0 %v247_v60 }
 0x2f5   :  { %254 = vadd.xlane.f32.xlu0 %v253_v62 }
 0x33d   :  { %v438_v63 = vpop.xlane.xlu0 %437 }
 0x341   :  { %v432_v0 = vpop.xlane.xlu0 %431 }
 0x345   :  { %v441_v1 = vpop.xlane.xlu0 %440  ;;  %v246_v15 = vpop.xlane.xlu1 %245 }
 0x346   :  { %697 = vrcp.f32 %v441_v1 }
 0x347   :  { %699 = vrcp.f32 %v432_v0 }
 0x348   :  { %701 = vrcp.f32 %v438_v63 }
 0x349   :  { %v435_v7 = vpop.xlane.xlu0 %434  ;;  %v252_v16 = vpop.xlane.xlu1 %251 }
 0x34a   :  { %703 = vrcp.f32 %v435_v7 }
 0x34b   :  { %705 = vrcp.f32 %v246_v15 }
 0x34d   :  { %v457_v2 = vpop.permute.xlu0 %456 }
 0x34e   :  { %658 = vmatprep.subr.bf16.mxu0 %v457_v2 }
 0x34f   :  { %659 = vmatpush3.bf16.msra.mxu0 %v457_v2 }
 0x350   :  { %v698_v3 = vpop.eup %697 }
 0x351   :  { %v700_v4 = vpop.eup %699  ;;  %v449_v8 = vmul.f32 %v698_v3, %v686_v45 }
 0x352   :  { %v702_v5 = vpop.eup %701  ;;  %v443_v10 = vmul.f32 %v700_v4, %v684_v43 }
 0x353   :  { %v447_v12 = vmul.f32 %v702_v5, %v682_v40 }
 0x354   :  { %v704_v6 = vpop.eup %703 }
 0x355   :  { %v445_v11 = vmul.f32 %v704_v6, %v690_v49  ;;  %v451_v14 = vpack.c.bf16 %v449_v8, %v447_v12  ;;  %v706_v20 = vpop.eup %705 }
 0x356   :  { %v257_v22 = vmul.f32 %v706_v20, %v688_v46 }
 0x357   :  { %v450_v13 = vpack.c.bf16 %v445_v11, %v443_v10 }
 0x359   :  { %660 = vmatprep.mubr.msk.bf16.mxu0 %vm219_vm4, %v450_v13 }
 0x35a   :  { %661 = vmatmul.mubr.msk.bf16.vlgmr.msra.gmra.mrb[4].mxu0 %vm219_vm4, %v451_v14 }
 0x37e   :  { %v249_v17 = vpop.xlane.xlu0 %248 }
 0x37f   :  { %707 = vrcp.f32 %v249_v17 }
 0x380   :  { %709 = vrcp.f32 %v252_v16 }
 0x382   :  { %v255_v19 = vpop.xlane.xlu0 %254 }
 0x383   :  { %711 = vrcp.f32 %v255_v19 }
 0x389   :  { %v708_v21 = vpop.eup %707 }
 0x38a   :  { %v259_v23 = vmul.f32 %v708_v21, %v694_v59  ;;  %v710_v24 = vpop.eup %709 }
 0x38b   :  { %v261_v27 = vmul.f32 %v710_v24, %v692_v50 }
 0x38c   :  { %v264_v25 = vpack.c.bf16 %v259_v23, %v257_v22 }
 0x38d   :  { %v712_v26 = vpop.eup %711 }
 0x38e   :  { %652 = vmatprep.mubr.msk.bf16.mxu1 %vm219_vm4, %v264_v25  ;;  %v263_v28 = vmul.f32 %v712_v26, %v696_v61 }
 0x390   :  { %v265_v29 = vpack.c.bf16 %v263_v28, %v261_v27 }
 0x392   :  { %653 = vmatmul.mubr.msk.bf16.vlgmr.msra.gmra.mrb[0].mxu1 %vm219_vm4, %v265_v29  ;;  %vm563_vm4 = vcmask 126016  }
 0x42d   :  { %v662_v30 = vpop.f32.mrb[4].mxu0 }
 0x42e   :  { %v521_v31 = vmin.f32 %v662_v30, 0.0  ;;  %v500_v9 = vpop.f32.mrb[5].mxu0  ;;  %vm517_vm12 = vcmp.gt.f32.partialorder %v662_v30, 0.0 }
 0x42f   :  { %v519_v32 = vmin.f32 %v500_v9, 0.0  ;;  %v663_v33 = vpop.f32.mrb[6].mxu0  ;;  %vm515_vm11 = vcmp.gt.f32.partialorder %v500_v9, 0.0 }
 0x430   :  { %v527_v34 = vmul.f32 1.442695, %v521_v31  ;;  %v522_v35 = vmin.f32 %v663_v33, 0.0  ;;  %v503_v36 = vpop.f32.mrb[7].mxu0  ;;  %vm518_vm14 = vcmp.gt.f32.partialorder %v663_v33, 0.0 }
 0x431   :  { %v523_v37 = vmul.f32 1.442695, %v519_v32  ;;  %v520_v38 = vmin.f32 %v503_v36, 0.0  ;;  %vm516_vm13 = vcmp.gt.f32.partialorder %v503_v36, 0.0 }
 0x432   :  { %713 = vpow2.f32 %v527_v34  ;;  %v529_v39 = vmul.f32 1.442695, %v522_v35 }
 0x433   :  { %715 = vpow2.f32 %v523_v37  ;;  %v525_v40 = vmul.f32 1.442695, %v520_v38 }
 0x434   :  { %717 = vpow2.f32 %v529_v39 }
 0x435   :  { %719 = vpow2.f32 %v525_v40 }
 0x43c   :  { %v714_v41 = vpop.eup %713 }
 0x43d   :  { %v716_v42 = vpop.eup %715  ;;  %v608_v44 = vadd.f32 -1.0, %v714_v41 }
 0x43e   :  { %v718_v43 = vpop.eup %717  ;;  %v606_v45 = vadd.f32 -1.0, %v716_v42 }
 0x43f   :  { %v720_v46 = vpop.eup %719  ;;  %v537_v50 = vsel %vm517_vm12, %v662_v30, %v608_v44  ;;  %v609_v51 = vadd.f32 -1.0, %v718_v43 }
 0x440   :  { %v535_v47 = vsel %vm515_vm11, %v500_v9, %v606_v45  ;;  %v607_v48 = vadd.f32 -1.0, %v720_v46  ;;  %v620_v54 = vpack.c.bf16 %v537_v50, %v537_v50 }
 0x441   :  { %v618_v49 = vpack.c.bf16 %v535_v47, %v535_v47  ;;  %v538_v55 = vsel %vm518_vm14, %v663_v33, %v609_v51 }
 0x442   :  { %v536_v52 = vsel %vm516_vm13, %v503_v36, %v607_v48  ;;  %v621_v56 = vpack.c.bf16 %v538_v55, %v538_v55 }
 0x443   :  { %v619_v53 = vpack.c.bf16 %v536_v52, %v536_v52  ;;  %551 = vrot.lane.b32.xlu1 %v618_v49, %s758_s22 }
 0x445   :  { %553 = vrot.lane.b32.xlu0 %v619_v53, %s758_s22 }
 0x447   :  { %555 = vrot.lane.b32.xlu1 %v620_v54, %s758_s22 }
 0x44b   :  { %557 = vrot.lane.b32.xlu1 %v621_v56, %s758_s22 }
 0x465   :  { %v654_v57 = vpop.f32.mrb[0].mxu1 }
 0x466   :  { %v327_v58 = vmin.f32 %v654_v57, 0.0  ;;  %v306_v59 = vpop.f32.mrb[1].mxu1  ;;  %vm323_vm15 = vcmp.gt.f32.partialorder %v654_v57, 0.0 }
 0x467   :  { %v325_v60 = vmin.f32 %v306_v59, 0.0  ;;  %v655_v61 = vpop.f32.mrb[2].mxu1  ;;  %vm321_vm0 = vcmp.gt.f32.partialorder %v306_v59, 0.0 }
 0x468   :  { %v333_v62 = vmul.f32 1.442695, %v327_v58  ;;  %v328_v63 = vmin.f32 %v655_v61, 0.0  ;;  %v309_v0 = vpop.f32.mrb[3].mxu1  ;;  %vm324_vm2 = vcmp.gt.f32.partialorder %v655_v61, 0.0 }
 0x469   :  { %v329_v1 = vmul.f32 1.442695, %v325_v60  ;;  %v326_v7 = vmin.f32 %v309_v0, 0.0  ;;  %vm322_vm3 = vcmp.gt.f32.partialorder %v309_v0, 0.0 }
 0x46a   :  { %721 = vpow2.f32 %v333_v62  ;;  %v335_v2 = vmul.f32 1.442695, %v328_v63 }
 0x46b   :  { %723 = vpow2.f32 %v329_v1  ;;  %v331_v3 = vmul.f32 1.442695, %v326_v7 }
 0x46c   :  { %725 = vpow2.f32 %v335_v2 }
 0x46d   :  { %727 = vpow2.f32 %v331_v3 }
 0x474   :  { %v722_v4 = vpop.eup %721 }
 0x475   :  { %v724_v5 = vpop.eup %723  ;;  %v598_v6 = vadd.f32 -1.0, %v722_v4 }
 0x476   :  { %v726_v8 = vpop.eup %725  ;;  %v596_v10 = vadd.f32 -1.0, %v724_v5 }
 0x477   :  { %v728_v11 = vpop.eup %727  ;;  %v343_v12 = vsel %vm323_vm15, %v654_v57, %v598_v6  ;;  %v599_v13 = vadd.f32 -1.0, %v726_v8 }
 0x478   :  { %v616_v14 = vpack.c.bf16 %v343_v12, %v343_v12  ;;  %v341_v15 = vsel %vm321_vm0, %v306_v59, %v596_v10  ;;  %v597_v16 = vadd.f32 -1.0, %v728_v11 }
 0x479   :  { %v614_v17 = vpack.c.bf16 %v341_v15, %v341_v15  ;;  %v344_v19 = vsel %vm324_vm2, %v655_v61, %v599_v13 }
 0x47a   :  { %v617_v20 = vpack.c.bf16 %v344_v19, %v344_v19  ;;  %v342_v21 = vsel %vm322_vm3, %v309_v0, %v597_v16  ;;  %364 = vst.msk [vmem:[#allocation3 + $0x8] sm:$0xf] %vm361_vm1, %v616_v14 }
 0x47b   :  { %v615_v22 = vpack.c.bf16 %v342_v21, %v342_v21  ;;  %362 = vst.msk [vmem:[#allocation3] sm:$0xf] %vm361_vm1, %v614_v17 }
 0x47c   :  { %365 = vst.msk [vmem:[#allocation3 + $0xc] sm:$0xf] %vm361_vm1, %v617_v20 }
 0x47d   :  { %363 = vst.msk [vmem:[#allocation3 + $0x4] sm:$0xf] %vm361_vm1, %v615_v22 }
 0x4b5   :  { %v552_v23 = vpop.permute.xlu1 %551 }
 0x4b6   :  { %564 = vst.msk [vmem:[#allocation3] sm:$0xf] %vm563_vm4, %v552_v23 }
 0x4b7   :  { %569 = vst.msk [vmem:[#allocation3] sm:$0xf] %vm568_vm5, %v756_v18  ;;  %v554_v24 = vpop.permute.xlu0 %553 }
 0x4b8   :  { %565 = vst.msk [vmem:[#allocation3 + $0x4] sm:$0xf] %vm563_vm4, %v554_v24 }
 0x4b9   :  { %570 = vst.msk [vmem:[#allocation3 + $0x4] sm:$0xf] %vm568_vm5, %v756_v18  ;;  %v556_v25 = vpop.permute.xlu1 %555 }
 0x4ba   :  { %566 = vst.msk [vmem:[#allocation3 + $0x8] sm:$0xf] %vm563_vm4, %v556_v25 }
 0x4bb   :  { %571 = vst.msk [vmem:[#allocation3 + $0x8] sm:$0xf] %vm568_vm5, %v756_v18 }
 0x4bd   :  { %v558_v26 = vpop.permute.xlu1 %557 }
 0x4be   :  { %567 = vst.msk [vmem:[#allocation3 + $0xc] sm:$0xf] %vm563_vm4, %v558_v26 }
 0x4bf   :  { %572 = vst.msk [vmem:[#allocation3 + $0xc] sm:$0xf] %vm568_vm5, %v756_v18 }
 0x4c0   :  { %740 = shalt.err (!%p737_p4)
}
 0x4c1   :  { %s741_s28 = scalar_lea.hbm %s853_s3, 256 }
 0x4c2   :  { %p742_p5 = scmp.ne.s32.totalorder %s853_s3, %s741_s28  ;;  %p745_p6 = scmp.lt.u32.totalorder %s741_s28, %s853_s3 }
 0x4c4   :  { %p747_p7 = pnand %p745_p6, %p742_p5 }
 0x4c6   :  { %750 = shalt.err (!%p747_p7)
}
 0x4c7   :  { %s760_s6 = smov 64   ;;  %s761_s7 = smov 4  }
 0x4c8   :  { %584 = dma.vmem_to_hbm [thread:$0]  %s579_s24, 256, %s853_s3, [#allocation4], %s760_s6, %s760_s6, %s761_s7  }
 0x4c9   :  { %751 = dma.done.wait [#allocation4], 256  }
 0x4ca   :  { %752 = vsyncadd [#allocation4], 4294967040 }
 0x4cb   :  { %588 = vsyncpa [#allocation4], 1 }

</bundles_post_ra>
